<compile_context>
chip_gen: v6e
topology: v6e:2x2x1
jax: 0.10.0
libtpu: 0.0.40
codegen_flags: <defaults>
</compile_context>

<pallas_src>
import jax
import jax.numpy as jnp
from jax.experimental import pallas as pl
from jax.experimental.pallas import tpu as pltpu


def _round_up(x, m):
    return -(-x // m) * m


def _largest_divisor_leq(n, k):
    for d in range(max(1, min(n, k)), 0, -1):
        if n % d == 0:
            return d
    return 1


def _vmem_budget():
    """(working-set budget for the 4 double-buffered tiles, scoped-VMEM limit)."""
    try:
        cap = int(pltpu.get_tpu_info().vmem_capacity_bytes)
    except Exception:
        cap = 64 << 20  # conservative: v7x per-TensorCore VMEM
    budget = min(int(cap * 0.625), 48 << 20)   # ~40 MiB on v7x, 48 MiB on v5e/v6e
    vmem_limit = min(cap, budget + (16 << 20))  # headroom for weight buffers + scratch
    return budget, vmem_limit


def _tile_plan(n, c, hw, budget):
    """Pick (nb batch-rows per step, tm lanes per step)."""
    c_pad = _round_up(c, 8)          # f32 sublane padding: a (C, TM) tile occupies ceil(C/8)*8 rows
    lane_bytes = c_pad * 4           # bytes per lane column per batch row
    max_lanes = max(128, budget // (4 * lane_bytes))  # 4 live buffers: in+out, double-buffered

    if max_lanes >= hw:
        tm = hw                      # full extent -> always a legal (and lane-clamped) block dim
    else:
        tm_cap = (max_lanes // 128) * 128
        tm = None
        if hw % 128 == 0:
            # Prefer the largest 128-multiple divisor of hw within budget: no masked edge tile.
            for d in range(min(tm_cap, hw) // 128, 0, -1):
                if hw % (d * 128) == 0:
                    tm = d * 128
                    break
        if tm is None:
            tm = tm_cap              # fallback: cdiv grid with one masked edge tile

    grid_m = pl.cdiv(hw, tm)

    # Tiny-activation path: pack several batch rows per grid step so per-step DMA is
    # not dwarfed by the ~0.35us pipeline overhead, but keep >= 2 grid steps when
    # possible so both v7x TensorCores get work.
    nb = 1
    tile_bytes = c_pad * tm * 4
    target = 2 << 20
    if grid_m == 1 and tile_bytes < target and n > 1:
        want = min(n, 8, max(1, target // tile_bytes))
        nb = _largest_divisor_leq(n, want)
        while nb > 1 and (n // nb) * grid_m < 2:
            nb = _largest_divisor_leq(n, nb - 1)
        while nb > 1 and 4 * nb * tile_bytes > budget:
            nb = _largest_divisor_leq(n, nb - 1)
    return nb, tm


def _make_kernel(nb):
    def kernel(w_ref, x_ref, out_ref):
        # w_ref: (C, C) assembled conv weight (out_ch, in_ch)
        # x_ref/out_ref: (nb, C, TM) pixels-on-lanes activation tiles
        w = w_ref[...]
        for b in range(nb):  # small static unroll over batch rows in this block
            out_ref[b] = jnp.dot(
                w,
                x_ref[b],
                preferred_element_type=jnp.float32,
                precision=jax.lax.Precision.HIGHEST,
            ).astype(out_ref.dtype)
    return kernel


def inv_conv2d_lu_forward(x, params):
    """x: (N, C, H, W) float32.  Returns (out (N, C, H, W), logdet scalar)."""
    n, c, h, w = x.shape
    w_p, w_l, w_u, w_s, s_sign, l_mask, u_mask, l_eye = params

    # Hoisted weight assembly + logdet (tiny, done once in plain JAX).
    weight = w_p @ (w_l * l_mask + l_eye) @ (
        w_u * u_mask + jnp.diag(s_sign * jnp.exp(w_s))
    )
    logdet = jnp.float32(h * w) * jnp.sum(w_s)

    hw = h * w
    x3 = x.reshape(n, c, hw)          # NCHW -> (N, C, HW): free view, no transpose

    budget, vmem_limit = _vmem_budget()
    nb, tm = _tile_plan(n, c, hw, budget)
    grid = (n // nb, pl.cdiv(hw, tm))

    out3 = pl.pallas_call(
        _make_kernel(nb),
        out_shape=jax.ShapeDtypeStruct((n, c, hw), jnp.float32),
        grid=grid,
        in_specs=[
            pl.BlockSpec((c, c), lambda b, i: (0, 0)),          # weight (grid-invariant)
            pl.BlockSpec((nb, c, tm), lambda b, i: (b, 0, i)),  # x tile
        ],
        out_specs=pl.BlockSpec((nb, c, tm), lambda b, i: (b, 0, i)),
        compiler_params=pltpu.CompilerParams(
            dimension_semantics=("parallel", "parallel"),
            vmem_limit_bytes=int(vmem_limit),
        ),
    )(weight, x3)

    out = out3.reshape(n, c, h, w)    # free view back to NCHW
    return out, logdet


def init_params(in_channel, key):
    """Deterministic re-implementation of InvConv2dLU.__init__ parameter setup."""
    w_init = jax.random.normal(key, (in_channel, in_channel), dtype=jnp.float32)
    q, _ = jnp.linalg.qr(w_init)
    w_p, w_l, w_u_full = jax.scipy.linalg.lu(q.astype(jnp.float32))
    w_s = jnp.diag(w_u_full)
    w_u = jnp.triu(w_u_full, 1)
    u_mask = jnp.triu(jnp.ones_like(w_u), 1)
    l_mask = u_mask.T
    s_sign = jnp.sign(w_s)
    l_eye = jnp.eye(in_channel, dtype=jnp.float32)
    w_s_log = jnp.log(jnp.abs(w_s))  # logabs(w_s), the trainable parameter
    return (
        w_p.astype(jnp.float32),
        w_l.astype(jnp.float32),
        w_u.astype(jnp.float32),
        w_s_log.astype(jnp.float32),
        s_sign.astype(jnp.float32),
        l_mask.astype(jnp.float32),
        u_mask.astype(jnp.float32),
        l_eye,
    )


def _reference(x, params):
    w_p, w_l, w_u, w_s, s_sign, l_mask, u_mask, l_eye = params
    weight = w_p @ (w_l * l_mask + l_eye) @ (
        w_u * u_mask + jnp.diag(s_sign * jnp.exp(w_s))
    )
    out = jnp.einsum('nchw,oc->nohw', x, weight)
    logdet = x.shape[2] * x.shape[3] * jnp.sum(w_s)
    return out, logdet


if __name__ == "__main__":
    key = jax.random.PRNGKey(0)
    k_param, k_x = jax.random.split(key)

    N, C, H, W = 2, 4, 16, 16
    params = init_params(C, k_param)
    x = jax.random.normal(k_x, (N, C, H, W), dtype=jnp.float32)

    out, logdet = inv_conv2d_lu_forward(x, params)
    out = jax.block_until_ready(out)
    logdet = jax.block_until_ready(logdet)

    ref_out, ref_logdet = _reference(x, params)
    assert out.shape == (N, C, H, W)
    assert jnp.allclose(out, ref_out, atol=1e-4, rtol=1e-4)
    assert jnp.allclose(logdet, ref_logdet, atol=1e-4, rtol=1e-4)

    print("KERNEL_OK")
</pallas_src>

<mosaic_0001>
module attributes {stable_mosaic.version = 11 : i64} {
  func.func @kernel(%arg0: i32, %arg1: i32, %arg2: memref<4x4xf32, #tpu.memory_space<vmem>>, %arg3: memref<1x4x256xf32, #tpu.memory_space<vmem>>, %arg4: memref<1x4x256xf32, #tpu.memory_space<vmem>>) attributes {dimension_semantics = [#tpu.dimension_semantics<parallel>, #tpu.dimension_semantics<parallel>], iteration_bounds = array<i64: 2, 1>, scalar_prefetch = 0 : i64, scratch_operands = 0 : i64, tpu.core_type = #tpu.core_type<tc>, window_params = [{pipeline_mode = #tpu.pipeline_mode<synchronous>, transform_indices = @transform_0, window_bounds = array<i64: 4, 4>}, {transform_indices = @transform_1, window_bounds = array<i64: 1, 4, 256>}, {transform_indices = @transform_2, window_bounds = array<i64: 1, 4, 256>}]} {
    %c0 = arith.constant 0 : index
    %c0_0 = arith.constant 0 : index
    %0 = vector.load %arg2[%c0, %c0_0] : memref<4x4xf32, #tpu.memory_space<vmem>>, vector<4x4xf32>
    %c0_1 = arith.constant 0 : index
    %c0_2 = arith.constant 0 : index
    %c0_3 = arith.constant 0 : index
    %1 = vector.load %arg3[%c0_1, %c0_2, %c0_3] : memref<1x4x256xf32, #tpu.memory_space<vmem>>, vector<1x4x256xf32>
    %2 = vector.shape_cast %1 : vector<1x4x256xf32> to vector<4x256xf32>
    %cst = arith.constant dense<0.000000e+00> : vector<4x256xf32>
    %3 = tpu.matmul %0, %2, %cst {dimension_numbers = #tpu.dot_dimension_numbers<[1], [0], [0], [1], [0, 0, 1, 1], [], []>, precision = #tpu.contract_precision<fp32>} : vector<4x4xf32>, vector<4x256xf32>, vector<4x256xf32> -> vector<4x256xf32>
    %c0_4 = arith.constant 0 : index
    %c0_5 = arith.constant 0 : index
    %c0_6 = arith.constant 0 : index
    %4 = vector.load %arg4[%c0_4, %c0_5, %c0_6] : memref<1x4x256xf32, #tpu.memory_space<vmem>>, vector<1x4x256xf32>
    %5 = vector.shape_cast %4 : vector<1x4x256xf32> to vector<4x256xf32>
    %6 = vector.shape_cast %3 : vector<4x256xf32> to vector<1x4x256xf32>
    tpu.vector_store %arg4[%c0_4, %c0_5, %c0_6], %6 {strides = array<i32>} : memref<1x4x256xf32, #tpu.memory_space<vmem>>, vector<1x4x256xf32>,
    return
  }
  func.func @transform_0(%arg0: i32, %arg1: i32) -> (i32, i32) {
    %c0_i32 = arith.constant 0 : i32
    %c0_i32_0 = arith.constant 0 : i32
    %c0_i32_1 = arith.constant 0 : i32
    return %c0_i32, %c0_i32_0 : i32, i32
  }
  func.func @transform_1(%arg0: i32, %arg1: i32) -> (i32, i32, i32) {
    %c0_i32 = arith.constant 0 : i32
    %c0_i32_0 = arith.constant 0 : i32
    return %arg0, %c0_i32, %arg1 : i32, i32, i32
  }
  func.func @transform_2(%arg0: i32, %arg1: i32) -> (i32, i32, i32) {
    %c0_i32 = arith.constant 0 : i32
    %c0_i32_0 = arith.constant 0 : i32
    return %arg0, %c0_i32, %arg1 : i32, i32, i32
  }
}

</mosaic_0001>

<bundles_post_ra>
// kernel: tpu_custom_call.1
= control target key start
LH: loop header
LB: loop body
LE: loop exit
PB: predicated region body
PF: predicated region fallthrough
CT: control target
= control target key end

     0   :  { %7 = vsyncpa [#allocation3], 0  ;;  %s1207_s0 = inlined_call_operand.hbm [shape: f32[4,4], index: 0, kind: input, shape index: {}]   ;;  %s1208_s1 = inlined_call_operand.hbm [shape: f32[2,4,256], index: 1, kind: input, shape index: {}]   ;;  %s1209_s2 = inlined_call_operand.hbm [shape: f32[2,4,256], index: 2, kind: output, shape index: {}]  }
   0x1   :  { %8 = vsyncpa [#allocation6], 0 }
   0x2   :  { %10 = vsyncpa [#allocation6 + $0x1], 0 }
   0x3   :  { %11 = vsyncpa [#allocation4], 0 }
   0x4   :  { %13 = vsyncpa [#allocation4 + $0x1], 0  ;;  %s1042_s9 = smov 0   ;;  %s1044_s10 = smov 0  }
   0x5   :  { %s1046_s11 = smov 0   ;;  %s1048_s12 = smov 0  }
   0x6   :  { %s1050_s13 = smov 0   ;;  %s1052_s14 = smov 0  }
   0x7 LB: > { %s789_s15 = sadd.s32 4294967295, %s1021_s14   ;;  %s790_s16 = sadd.s32 4294967294, %s1021_s14   ;;  %s1021_s14 = sphi %s1052_s14, %s19_s14   ;;  %s1017_s13 = sphi %s1050_s13, %s1226_s13   ;;  %s1013_s12 = sphi %s1048_s12, %s1225_s12   ;;  %s1009_s11 = sphi %s1046_s11, %s1224_s11   ;;  %s1005_s10 = sphi %s1044_s10, %s1223_s10   ;;  %s1001_s9 = sphi %s1042_s9, %s1222_s9  }
   0x8   : > { %p74_p0 = scmp.ne.s32.totalorder %s1005_s10, %s1001_s9  ;;  %p1076_p1 = scmp.eq.s32.totalorder %s789_s15, 0 }
   0x9   : > { %p1080_p2 = scmp.eq.s32.totalorder %s789_s15, 1  ;;  %p106_p3 = scmp.eq.s32.totalorder %s790_s16, 1 }
   0xa   : > { %p1086_p4 = por %p1076_p1, %p74_p0  ;;  %p791_p5 = scmp.ge.s32.totalorder %s1021_s14, 1 }
   0xb   : > { %p1091_p6 = por %p106_p3, %p74_p0  ;;  %p113_p7 = scmp.lt.s32.totalorder %s1021_s14, 3 }
   0xc   : > { %s1213_s19 = scalar_select %p1086_p4, 1, 0 }
   0xd   : > { %s1214_s20 = scalar_select %p1091_p6, 1, 0 }
   0xe   : > { %p1096_p8 = pnand %p791_p5, %p113_p7  ;;  %s1023_s22 = smov [#allocation2]  }
   0xf   : > { %s126_s23 = sshll.u32 %s1023_s22, 4  ;;  %s31_s25 = sadd.s32 1, %s1017_s13  ;;  %s127_s23 = int_to_ptr.vmem [resolvable:$true] %s126_s23 }
  0x10   : > { %p816_p10 = pneg %p1096_p8  ;;  %s61_s26 = sadd.s32 1, %s1009_s11 }
  0x11   : > { %p33_p12 = scmp.ge.s32.totalorder %s31_s25, 2  ;;  %s894_s27 = scalar_lea.vmem %s127_s23, 64 }
  0x12   : > { %p1105_p11 = pnand %p816_p10, %p1076_p1  ;;  %p895_p0 = scmp.ne.s32.totalorder %s127_s23, %s894_s27 }
  0x13   : > { %p902_p7 = scmp.lt.s32.totalorder %s127_s23, %s127_s23  ;;  %p903_p6 = scmp.lt.s32.totalorder %s894_s27, %s894_s27 }
  0x14   : > { %p885_p13 = pneg %p1105_p11 }
  0x15   : > { %p904_p9 = por %p903_p6, %p902_p7 }
  0x16   : > { %p897_p3 = pnand %p895_p0, %p885_p13 }
  0x18   : > { %p898_p5 = pneg %p897_p3 }
  0x1a   : > { %p905_p4 = pnand %p904_p9, %p898_p5 }
  0x1c   : > { %908 = shalt.err (!%p905_p4)
}
  0x1d   : > { %819 = dma.hbm_to_vmem [thread:$0]  (!%p1105_p11), %s1207_s0, 64, %s127_s23, [#allocation3]  }
  0x1e   : > { %s1228_s25 = smov (%p33_p12, %s31_s25), 0  ;;  %p68_p6 = scmp.ne.s32.totalorder %s1009_s11, %s1005_s10 }
  0x1f   : > { %p69_p4 = scmp.eq.s32.totalorder %s1021_s14, 0  ;;  %s56_s30 = ssub.s32 %s1017_s13, %s1228_s25 }
  0x20   : > { %p829_p9 = scmp.lt.s32.totalorder %s1021_s14, 2  ;;  %p59_p10 = scmp.eq.s32.totalorder %s56_s30, 0 }
  0x21   : > { %p70_p13 = por %p69_p4, %p68_p6  ;;  %p1128_p0 = por %p1080_p2, %p68_p6 }
  0x22   : > { %s137_s4 = sand.u32 1, %s1009_s11   ;;  %s806_s7 = sshll.u32 %s1017_s13, 7 }
  0x23   : > { %s1134_s5 = scalar_select %p59_p10, %s1009_s11, %s61_s26  }
  0x24   : > { %s794_s6 = sshll.u32 %s137_s4, 3  ;;  %s149_s16 = scalar_lea.hbm %s1208_s1, %s806_s7 }
  0x25   : > { %s141_s22 = scalar_lea.vmem [#allocation5], %s794_s6  ;;  %p1140_p11 = pnand %p829_p9, %p70_p13 }
  0x26   : > { %s151_s23 = sshll.u32 %s141_s22, 4  ;;  %s138_s18 = scalar_lea.sflag [#allocation6], %s137_s4  ;;  %s152_s23 = int_to_ptr.vmem [resolvable:$true] %s151_s23 }
  0x27   : > { %p911_p2 = pneg %p1140_p11  ;;  %s922_s27 = scalar_lea.vmem %s152_s23, 128 }
  0x28   : > { %p923_p12 = scmp.ne.s32.totalorder %s152_s23, %s922_s27  ;;  %s1024_s26 = smov [#allocation5]  }
  0x29   : > { %s927_s28 = sshll.u32 %s1024_s26, 4  ;;  %s928_s28 = int_to_ptr.vmem [resolvable:$false] %s927_s28 }
  0x2a   : > { %p925_p3 = pnand %p923_p12, %p911_p2  ;;  %s929_s29 = scalar_lea.vmem %s928_s28, 256 }
  0x2b   : > { %p930_p7 = scmp.lt.s32.totalorder %s152_s23, %s928_s28  ;;  %p931_p6 = scmp.lt.s32.totalorder %s929_s29, %s922_s27 }
  0x2c   : > { %p926_p5 = pneg %p925_p3 }
  0x2d   : > { %p932_p4 = por %p931_p6, %p930_p7 }
  0x2f   : > { %p933_p10 = pnand %p932_p4, %p926_p5 }
  0x31   : > { %936 = shalt.err (!%p933_p10)
}
  0x32   : > { %823 = dma.hbm_to_vmem [thread:$0]  (!%p1140_p11), %s149_s16, 128, %s152_s23, %s138_s18  }
  0x33   : > { %160 = sbr.rel (%p1096_p8) target bundleno = 298 (0x12a), region = 28 }
  0x38   : > { %988 = dma.done.wait (%p1076_p1), [#allocation3], 64  }
  0x39   : > { %990 = vsyncadd (%p1076_p1), [#allocation3], 4294967232  ;;  %s1155_s30 = sand.u32 1, %s1005_s10   ;;  %p1219_p9 = scmp.ne.s32.totalorder %s1213_s19, 0 }
  0x3a   : > { %s799_s4 = sshll.u32 %s1155_s30, 3  ;;  %s167_s6 = scalar_lea.sflag [#allocation6], %s1155_s30 }
  0x3b   : > { %s170_s7 = scalar_lea.vmem [#allocation5], %s799_s4 }
  0x3c   : > { %992 = dma.done.wait (%p1219_p9), %s167_s6, 128  }
  0x3d   : > { %994 = vsyncadd (%p1219_p9), %s167_s6, 4294967168  ;;  %v1025_v0 = vmov 0.0   ;;  %vm201_vm0 = vcmask 1043456   ;;  %vm197_vm1 = vcmask 31744   ;;  %v194_v1 = vld [vmem:[%s170_s7] sm:$0xff]  ;;  %s807_s17 = sshll.u32 %s1013_s12, 7 }
  0x3e   : > { %272 = vmatprep.mubr.f32.mxu0 %v1025_v0  ;;  %358 = vmatprep.mubr.f32.mxu1 %v1025_v0  ;;  %v193_v2 = vld [vmem:[#allocation2] sm:$0xf]  ;;  %v196_v3 = vcombine.high %v194_v1, %v194_v1  ;;  %v202_v4 = vsel %vm201_vm0, %v194_v1, 0  ;;  %s190_s19 = scalar_lea.vmem [#allocation7], %s799_s4  ;;  %s691_s16 = scalar_lea.hbm %s1209_s2, %s807_s17 }
  0x3f   : > { %v199_v5 = vsel %vm197_vm1, %v193_v2, 0  ;;  %v238_v6 = vand.u32 4294901760, %v202_v4  ;;  %s693_s21 = sshll.u32 %s190_s19, 4  ;;  %s677_s22 = scalar_lea.sflag [#allocation4], %s1155_s30  ;;  %s694_s21 = int_to_ptr.vmem [resolvable:$true] %s693_s21 }
  0x40   : > { %v273_v7 = vand.u32 4294901760, %v199_v5  ;;  %v204_v8 = vsel %vm201_vm0, %v196_v3, 0  ;;  %s937_s23 = scalar_lea.vmem %s694_s21, 128  ;;  %s1026_s24 = smov [#allocation7]  }
  0x41   : > { %v236_v9 = vand.u32 4294901760, %v204_v8  ;;  %v321_v11 = vsub.f32 %v202_v4, %v238_v6  ;;  %p938_p1 = scmp.ne.s32.totalorder %s694_s21, %s937_s23  ;;  %s941_s12 = sshll.u32 %s1026_s24, 4  ;;  %s942_s12 = int_to_ptr.vmem [resolvable:$false] %s941_s12 }
  0x42   : > { %v274_v10 = vsub.f32 %v199_v5, %v273_v7  ;;  %s943_s18 = scalar_lea.vmem %s942_s12, 256  ;;  %p944_p11 = scmp.lt.s32.totalorder %s694_s21, %s942_s12 }
  0x43   : > { %237 = vmatprep.subr.mxu0 %v236_v9  ;;  %v315_v13 = vsub.f32 %v204_v8, %v236_v9  ;;  %v322_v14 = vand.u32 4294901760, %v321_v11  ;;  %p939_p8 = pnand %p938_p1, %p1128_p0  ;;  %p945_p2 = scmp.lt.s32.totalorder %s943_s18, %s937_s23 }
  0x44   : > { %v275_v12 = vand.u32 4294901760, %v274_v10  ;;  %239 = vmatpush1.msra.mxu0 %v238_v6 }
  0x45   : > { %v316_v16 = vand.u32 4294901760, %v315_v13  ;;  %398 = vmatprep.subr.mxu0 %v315_v13  ;;  %v323_v17 = vsub.f32 %v321_v11, %v322_v14  ;;  %p940_p13 = pneg %p939_p8  ;;  %p946_p12 = por %p945_p2, %p944_p11 }
  0x46   : > { %v276_v15 = vsub.f32 %v274_v10, %v275_v12 }
  0x47   : > { %v317_v19 = vsub.f32 %v315_v13, %v316_v16  ;;  %v324_v20 = vand.u32 4294901760, %v323_v17  ;;  %p947_p3 = pnand %p946_p12, %p940_p13 }
  0x48   : > { %v277_v18 = vand.u32 4294901760, %v276_v15 }
  0x49   : > { %v318_v21 = vand.u32 4294901760, %v317_v19 }
  0x4a   : > { %278 = vmatmul.mubr.f32.vlgmr.msra.gmra.mxu0 %v277_v18 }
  0x4b   : > { %401 = vmatpush1.msra.mxu0 %v321_v11  ;;  %434 = vmatprep.mubr.f32.mxu0 %v1025_v0 }
  0x4c   : > { %319 = vmatprep.subr.mxu1 %v318_v21  ;;  %552 = vmatprep.subr.mxu0 %v316_v16 }
  0x4d   : > { %325 = vmatpush1.msra.mxu1 %v324_v20 }
  0x4e   : > { %360 = vmatmul.mubr.f32.vlgmr.msra.gmra.mxu1 %v273_v7  ;;  %474 = vmatprep.subr.mxu1 %v236_v9 }
  0x4f   : > { %437 = vmatmul.mubr.f32.vlgmr.msra.gmra.mxu0 %v274_v10  ;;  %476 = vmatpush1.msra.mxu1 %v238_v6 }
  0x50   : > { %509 = vmatprep.mubr.f32.mxu1 %v1025_v0  ;;  %556 = vmatpush1.msra.mxu0 %v322_v14 }
  0x51   : > { %589 = vmatprep.mubr.f32.mxu0 %v1025_v0  ;;  %628 = vmatprep.subr.mxu1 %v236_v9 }
  0x52   : > { %513 = vmatmul.mubr.f32.vlgmr.msra.gmra.mxu1 %v275_v12 }
  0x53   : > { %591 = vmatmul.mubr.f32.vlgmr.msra.gmra.mxu0 %v273_v7  ;;  %630 = vmatpush1.msra.mxu1 %v238_v6 }
  0x54   : > { %663 = vmatprep.mubr.f32.mxu1 %v1025_v0 }
  0x56   : > { %665 = vmatmul.mubr.f32.vlgmr.msra.gmra.mxu1 %v273_v7 }
 0x10a   : > { %v279_v22 = vpop.f32.mrf.mxu0 }
 0x10c   : > { %v281_v23 = vpop.f32.mrf.mxu0 }
 0x10e   : > { %v361_v24 = vpop.f32.mrf.mxu1 }
 0x10f   : > { %v362_v25 = vadd.f32 %v361_v24, %v279_v22  ;;  %v438_v26 = vpop.f32.mrf.mxu0 }
 0x110   : > { %v363_v27 = vpop.f32.mrf.mxu1 }
 0x111   : > { %v439_v28 = vadd.f32 %v438_v26, %v362_v25  ;;  %v364_v29 = vadd.f32 %v363_v27, %v281_v23  ;;  %v440_v30 = vpop.f32.mrf.mxu0 }
 0x112   : > { %v514_v31 = vpop.f32.mrf.mxu1 }
 0x113   : > { %v441_v32 = vadd.f32 %v440_v30, %v364_v29  ;;  %v515_v33 = vadd.f32 %v514_v31, %v439_v28  ;;  %v592_v34 = vpop.f32.mrf.mxu0 }
 0x114   : > { %v516_v35 = vpop.f32.mrf.mxu1 }
 0x115   : > { %v593_v36 = vadd.f32 %v592_v34, %v515_v33  ;;  %v517_v37 = vadd.f32 %v516_v35, %v441_v32  ;;  %v594_v38 = vpop.f32.mrf.mxu0 }
 0x116   : > { %v666_v39 = vpop.f32.mrf.mxu1 }
 0x117   : > { %v595_v40 = vadd.f32 %v594_v38, %v517_v37  ;;  %v667_v42 = vadd.f32 %v666_v39, %v593_v36 }
 0x118   : > { %v668_v41 = vpop.f32.mrf.mxu1 }
 0x119   : > { %v669_v43 = vadd.f32 %v668_v41, %v595_v40 }
 0x11b   : > { %v673_v44 = vcombine.low %v667_v42, %v669_v43 }
 0x11d   : > { %675 = vst [vmem:[%s190_s19] sm:$0xff] %v673_v44 }
 0x11e   : > { %950 = shalt.err (!%p947_p3)
}
 0x11f   : > { %s951_s27 = scalar_lea.hbm %s691_s16, 128  ;;  %s955_s29 = scalar_lea.hbm %s1209_s2, 256 }
 0x120   : > { %p952_p5 = scmp.ne.s32.totalorder %s691_s16, %s951_s27  ;;  %p956_p4 = scmp.lt.s32.totalorder %s691_s16, %s1209_s2 }
 0x121   : > { %p957_p10 = scmp.lt.s32.totalorder %s955_s29, %s951_s27 }
 0x122   : > { %p953_p7 = pnand %p952_p5, %p1128_p0 }
 0x123   : > { %p958_p9 = por %p957_p10, %p956_p4 }
 0x124   : > { %p954_p6 = pneg %p953_p7 }
 0x126   : > { %p959_p1 = pnand %p958_p9, %p954_p6 }
 0x128   : > { %962 = shalt.err (!%p959_p1)
}
 0x129   : > { %814 = dma.vmem_to_hbm [thread:$0]  (%p1128_p0), %s694_s21, 128, %s691_s16, %s677_s22  }
 0x12a PF: > { %s705_s6 = sand.u32 1, %s1001_s9   ;;  %p1220_p8 = scmp.ne.s32.totalorder %s1214_s20, 0 }
 0x12b   : > { %p1221_p13 = scmp.ge.s32.totalorder %s1021_s14, 2  ;;  %s706_s7 = scalar_lea.sflag [#allocation4], %s705_s6 }
 0x12d   : > { %p825_p11 = pnand %p1221_p13, %p1220_p8 }
 0x12f   : > { %p826_p2 = pneg %p825_p11 }
 0x131   : > { %996 = dma.done.wait (%p826_p2), %s706_s7, 128  }
 0x132   : > { %998 = vsyncadd (%p826_p2), %s706_s7, 4294967168  ;;  %s19_s14 = sadd.s32 1, %s1021_s14   ;;  %s1222_s9 = smov %s1005_s10 }
 0x133   : > { %p16_p12 = scmp.ge.s32.totalorder %s19_s14, 4   ;;  %s1223_s10 = smov %s1009_s11 }
 0x134   : > { %s1224_s11 = smov %s1134_s5  ;;  %s1225_s12 = smov %s1017_s13 }
 0x135   : > { %s1226_s13 = smov %s1228_s25  ;;  %18 = sbr.rel (!%p16_p12) target bundleno = 7 (0x7), region = 78 }
 0x13a   :  { %711 = vsyncpa [#allocation3], 1 }
 0x13b   :  { %713 = vsyncpa [#allocation3 + $0x1], 1 }
 0x13c   :  { %714 = vsyncpa [#allocation6], 1 }
 0x13d   :  { %716 = vsyncpa [#allocation6 + $0x1], 1 }
 0x13e   :  { %717 = vsyncpa [#allocation4], 1 }
 0x13f   :  { %719 = vsyncpa [#allocation4 + $0x1], 1 }

</bundles_post_ra>
